<compile_context>
chip_gen: v6e
topology: v6e:2x2x1
jax: 0.10.0
libtpu: 0.0.40
codegen_flags: <defaults>
</compile_context>

<pallas_src>
import numpy as np
import jax
import jax.numpy as jnp
from jax.experimental import pallas as pl
from jax.experimental.pallas import tpu as pltpu

H = W = 14            # forced by the .view(bs, 4, 7, 7) in Quanv2d
OH = OW = 7
N_PATCH = OH * OW     # 49
N_QUBITS = 4
N_STATES = 16
N_PIX = H * W         # 196
C_OUT = 8 * N_PATCH   # 392
C_OUT_PAD = 512       # lane-dense padded classic output width
PI_OVER_4 = 0.7853981633974483


# ----------------------------- Pallas kernel ------------------------------ #
def inception_kernel(x_ref, qin_ref, g_ref, bfold_ref, ucat_ref, ztcat_ref,
                     outc_ref, outq_ref):
    # ---- classic branch: both convs + biases folded into one MXU matmul ----
    outc_ref[...] = (jnp.dot(x_ref[...], g_ref[...],
                             preferred_element_type=jnp.float32)
                     + bfold_ref[...])                                 # (TB, 512)

    # ---- quantum branch: exact 4-qubit statevector over all (batch, patch) lanes ----
    ang = qin_ref[...]                          # (4, NL) angles, qubit on sublanes
    phi = ang * 0.5 + PI_OVER_4
    a0 = jnp.cos(phi)                           # |0> amplitude after H,RY = (c - s)/sqrt2
    a1 = jnp.sin(phi)                           # |1> amplitude            = (c + s)/sqrt2

    # pairwise product tree: r[4*i01 + i23] = r01[i01] * r23[i23],
    # i01 = 2*b0 + b1, i23 = 2*b2 + b3 (wire 0 = MSB, matching the Z readout).
    def pair(i, j):
        aj = jnp.concatenate([a0[j:j + 1, :], a1[j:j + 1, :]], axis=0)          # (2, NL)
        return jnp.concatenate([a0[i:i + 1, :] * aj, a1[i:i + 1, :] * aj],
                               axis=0)                                          # (4, NL)

    r01 = pair(0, 1)
    r23 = pair(2, 3)
    r = jnp.concatenate([r01[k:k + 1, :] * r23 for k in range(4)], axis=0)      # (16, NL)

    # CRZ phases folded on host into Ucat = [U diag(cos phi); U diag(sin phi)]
    F = jnp.dot(ucat_ref[...], r, preferred_element_type=jnp.float32)           # (32, NL)
    prob = F * F                                                                # re^2 / im^2 halves
    outq_ref[...] = jnp.dot(ztcat_ref[...], prob,
                            preferred_element_type=jnp.float32)                 # (4, NL)


# ------------------------------ host helpers ------------------------------ #
def build_conv_select():
    """S[k, ih*14+iw, oh*7+ow] = 1 for tap k=(kh,kw) of Conv2d(4,8,4,stride=2,pad=1)."""
    S = np.zeros((16, N_PIX, N_PATCH), np.float32)
    for kh in range(4):
        for kw in range(4):
            k = kh * 4 + kw
            for oh in range(OH):
                for ow in range(OW):
                    ih = 2 * oh + kh - 1
                    iw = 2 * ow + kw - 1
                    if 0 <= ih < H and 0 <= iw < W:
                        S[k, ih * W + iw, oh * OW + ow] = 1.0
    return S


def fold_classic(w1, b1, w2, b2, cin):
    """Fold conv1x1 + conv4x4(s2,p1) + both biases into (G, b_fold), N padded to 512."""
    S = jnp.asarray(build_conv_select())                    # (16, 196, 49)
    w2r = w2.reshape(8, 4, 16)                              # (oc, c4, kh*4+kw)
    G = jnp.einsum('ci,ock,kxp->ixop', w1, w2r, S)          # (Cin, 196, 8, 49)
    G = G.reshape(cin * N_PIX, C_OUT)
    inb = jnp.sum(S, axis=1)                                # (16, 49): tap in-bounds mask
    bfold = jnp.einsum('ock,c,kp->op', w2r, b1, inb) + b2[:, None]
    bfold = bfold.reshape(1, C_OUT)
    # zero-pad the N dimension to 512 -> unmasked lane-dense output stores
    G = jnp.pad(G, ((0, 0), (0, C_OUT_PAD - C_OUT)))
    bfold = jnp.pad(bfold, ((0, 0), (0, C_OUT_PAD - C_OUT)))
    return G, bfold


def quantum_constants(qw):
    """Weight-only circuit constants: phase-folded RY unitary (32,16), fused Z readout (4,32)."""
    bits_np = np.array([[(s >> (3 - q)) & 1 for q in range(N_QUBITS)]
                        for s in range(N_STATES)], np.float32)        # wire 0 = MSB
    bits = jnp.asarray(bits_np)
    phase = jnp.zeros((N_STATES,), jnp.float32)
    for i in range(N_QUBITS):
        t = (i + 1) % N_QUBITS
        phase = phase + (qw[0, i] * 0.5) * bits[:, i] * (2.0 * bits[:, t] - 1.0)
    cph = jnp.cos(phase)
    sph = jnp.sin(phase)
    U = jnp.array([[1.0]], jnp.float32)
    for q in range(N_QUBITS):
        psi = qw[0, 4 + q]
        c, s = jnp.cos(psi / 2.0), jnp.sin(psi / 2.0)
        Rq = jnp.stack([jnp.stack([c, -s]), jnp.stack([s, c])])
        U = jnp.kron(U, Rq)
    U = U.astype(jnp.float32)
    ucat = jnp.concatenate([U * cph[None, :], U * sph[None, :]], axis=0)   # (32, 16)
    zt = (1.0 - 2.0 * bits.T).astype(jnp.float32)                          # (4, 16)
    ztcat = jnp.concatenate([zt, zt], axis=1)                              # (4, 32)
    return ucat, ztcat


# ------------------------------ forward pass ------------------------------ #
def inception_forward(x, w1, b1, w2, b2, qw):
    B, Cin = x.shape[0], x.shape[1]
    G, bfold = fold_classic(w1, b1, w2, b2, Cin)
    ucat, ztcat = quantum_constants(qw)

    # Batch tile selection: big tiles amortize per-grid-step overhead and fill
    # the MXU M dimension; keep >=2 grid steps for large B so v7x's two
    # TensorCores both get work via the "parallel" grid axis.
    Bp8 = max(8, -(-B // 8) * 8)
    if Bp8 <= 256:
        TB = Bp8            # single block (block == full array, lane rule OK)
    elif Bp8 <= 1024:
        TB = 256            # nb >= 2; TB*49 is a multiple of 128
    else:
        TB = 512
    nb = -(-B // TB)
    Bp = nb * TB

    xf = x.reshape(B, Cin * N_PIX).astype(jnp.float32)
    if Bp != B:
        xf = jnp.pad(xf, ((0, Bp - B), (0, 0)))

    # Quantum patch extraction as pure layout plumbing (channel 0 only — the
    # torch Quanv2d circuit consumes exactly 4 inputs, i.e. in_channels == 1).
    # qin[dh*2+dw, b*49 + pi*7+pj] = x[b, 0, 2*pi+dh, 2*pj+dw]
    # (kept as a separate lane-dense HBM array; could be gathered in-kernel
    #  from x_ref if this kernel ever becomes HBM-bound.)
    x0 = xf[:, :N_PIX].reshape(Bp, OH, 2, OW, 2)
    qin = jnp.transpose(x0, (2, 4, 0, 1, 3)).reshape(N_QUBITS, Bp * N_PATCH)

    NL = TB * N_PATCH     # quantum lane-tile width

    in_specs = [
        pl.BlockSpec((TB, Cin * N_PIX), lambda i: (i, 0)),          # x tile
        pl.BlockSpec((N_QUBITS, NL), lambda i: (0, i)),             # qin tile
        pl.BlockSpec((Cin * N_PIX, C_OUT_PAD), lambda i: (0, 0)),   # G (const)
        pl.BlockSpec((1, C_OUT_PAD), lambda i: (0, 0)),             # folded bias
        pl.BlockSpec((2 * N_STATES, N_STATES), lambda i: (0, 0)),   # Ucat
        pl.BlockSpec((N_QUBITS, 2 * N_STATES), lambda i: (0, 0)),   # fused Z readout
    ]
    out_specs = [
        pl.BlockSpec((TB, C_OUT_PAD), lambda i: (i, 0)),            # classic, lane-dense
        pl.BlockSpec((N_QUBITS, NL), lambda i: (0, i)),             # quantum, lane-dense
    ]
    out_shape = [
        jax.ShapeDtypeStruct((Bp, C_OUT_PAD), jnp.float32),
        jax.ShapeDtypeStruct((N_QUBITS, Bp * N_PATCH), jnp.float32),
    ]

    outc, outq = pl.pallas_call(
        inception_kernel,
        grid=(nb,),
        in_specs=in_specs,
        out_specs=out_specs,
        out_shape=out_shape,
        compiler_params=pltpu.CompilerParams(dimension_semantics=("parallel",)),
    )(xf, qin, G, bfold, ucat, ztcat)

    classic = outc[:B, :C_OUT].reshape(B, 8, OH, OW)
    # torch: cat of 49 (B,4) patch outputs along dim 1, then .view(B,4,7,7)
    qper = outq.reshape(N_QUBITS, Bp, N_PATCH)[:, :B, :]            # (4, B, 49)
    quantum = jnp.transpose(qper, (1, 2, 0)).reshape(B, 4, OH, OW)
    return jnp.concatenate([classic, quantum], axis=1)              # (B, 12, 7, 7)


# ------------------------ pure-JAX reference (check) ----------------------- #
def reference_forward(x, w1, b1, w2, b2, qw):
    B, Cin = x.shape[0], x.shape[1]
    dn = ('NCHW', 'OIHW', 'NCHW')
    c1 = jax.lax.conv_general_dilated(x, w1.reshape(4, Cin, 1, 1), (1, 1), 'VALID',
                                      dimension_numbers=dn) + b1.reshape(1, 4, 1, 1)
    c2 = jax.lax.conv_general_dilated(c1, w2, (2, 2), [(1, 1), (1, 1)],
                                      dimension_numbers=dn) + b2.reshape(1, 8, 1, 1)

    def simulate(inp):                                         # inp: (B, 4) angles
        th = inp * 0.5
        lo = (jnp.cos(th) - jnp.sin(th)) / np.sqrt(2.0)
        hi = (jnp.cos(th) + jnp.sin(th)) / np.sqrt(2.0)
        cols = []
        for idx in range(16):
            v = jnp.ones((B,), jnp.float32)
            for q in range(4):
                bit = (idx >> (3 - q)) & 1
                v = v * (hi[:, q] if bit else lo[:, q])
            cols.append(v)
        state = jnp.stack(cols, axis=1).astype(jnp.complex64)  # (B, 16)
        for i in range(4):
            t = (i + 1) % 4
            sgn = jnp.array([((idx >> (3 - i)) & 1) * (2 * ((idx >> (3 - t)) & 1) - 1)
                             for idx in range(16)], jnp.float32)
            state = state * jnp.exp(1j * (qw[0, i] * 0.5) * sgn)[None, :]
        U = jnp.array([[1.0]], jnp.float32)
        for q in range(4):
            psi = qw[0, 4 + q]
            c, s = jnp.cos(psi / 2.0), jnp.sin(psi / 2.0)
            Rq = jnp.stack([jnp.stack([c, -s]), jnp.stack([s, c])])
            U = jnp.kron(U, Rq)
        state = state @ U.T.astype(jnp.complex64)
        probs = jnp.abs(state) ** 2
        outs = []
        for q in range(4):
            zq = jnp.array([1.0 - 2.0 * ((idx >> (3 - q)) & 1) for idx in range(16)],
                           jnp.float32)
            outs.append(probs @ zq)
        return jnp.stack(outs, axis=1)                         # (B, 4)

    qouts = []
    for i in range(0, H - 1, 2):
        for j in range(0, W - 1, 2):
            patch = x[:, 0, i:i + 2, j:j + 2].reshape(B, 4)
            qouts.append(simulate(patch))
    quantum = jnp.concatenate(qouts, axis=1).reshape(B, 4, OH, OW)
    return jnp.concatenate([c2, quantum], axis=1)


# ---------------------------------- main ----------------------------------- #
if __name__ == "__main__":
    key = jax.random.PRNGKey(0)
    ks = jax.random.split(key, 6)
    B, Cin = 2, 1                                              # H=W=14 forced by module
    x = jax.random.normal(ks[0], (B, Cin, H, W), jnp.float32)
    # deterministic synthetic parameters (shapes from the module __init__)
    w1 = jax.random.normal(ks[1], (4, Cin), jnp.float32) * 0.5        # Conv2d(Cin, 4, 1)
    b1 = jax.random.normal(ks[2], (4,), jnp.float32) * 0.1
    w2 = jax.random.normal(ks[3], (8, 4, 4, 4), jnp.float32) * 0.2    # Conv2d(4, 8, 4, s=2, p=1)
    b2 = jax.random.normal(ks[4], (8,), jnp.float32) * 0.1
    qw = jax.random.uniform(ks[5], (1, 8), jnp.float32, 0.0, 2.0 * np.pi)  # (n_layers, 2*n_qubits)

    fwd = jax.jit(inception_forward)   # constants const-fold / build once per compile
    out = jax.block_until_ready(fwd(x, w1, b1, w2, b2, qw))
    ref = reference_forward(x, w1, b1, w2, b2, qw)

    assert out.shape == (B, 12, OH, OW), out.shape
    if not np.allclose(np.asarray(out), np.asarray(ref), atol=5e-4, rtol=5e-4):
        raise AssertionError(
            "mismatch vs reference: max abs diff %e"
            % float(np.max(np.abs(np.asarray(out) - np.asarray(ref)))))
    print("KERNEL_OK")
</pallas_src>

<mosaic_0001>
module attributes {stable_mosaic.version = 11 : i64} {
  func.func @inception_kernel(%arg0: i32, %arg1: memref<8x196xf32, #tpu.memory_space<vmem>>, %arg2: memref<4x392xf32, #tpu.memory_space<vmem>>, %arg3: memref<196x512xf32, #tpu.memory_space<vmem>>, %arg4: memref<1x512xf32, #tpu.memory_space<vmem>>, %arg5: memref<32x16xf32, #tpu.memory_space<vmem>>, %arg6: memref<4x32xf32, #tpu.memory_space<vmem>>, %arg7: memref<8x512xf32, #tpu.memory_space<vmem>>, %arg8: memref<4x392xf32, #tpu.memory_space<vmem>>) attributes {dimension_semantics = [#tpu.dimension_semantics<parallel>], iteration_bounds = array<i64: 1>, scalar_prefetch = 0 : i64, scratch_operands = 0 : i64, tpu.core_type = #tpu.core_type<tc>, window_params = [{transform_indices = @transform_0, window_bounds = array<i64: 8, 196>}, {transform_indices = @transform_1, window_bounds = array<i64: 4, 392>}, {pipeline_mode = #tpu.pipeline_mode<synchronous>, transform_indices = @transform_2, window_bounds = array<i64: 196, 512>}, {pipeline_mode = #tpu.pipeline_mode<synchronous>, transform_indices = @transform_3, window_bounds = array<i64: 1, 512>}, {pipeline_mode = #tpu.pipeline_mode<synchronous>, transform_indices = @transform_4, window_bounds = array<i64: 32, 16>}, {pipeline_mode = #tpu.pipeline_mode<synchronous>, transform_indices = @transform_5, window_bounds = array<i64: 4, 32>}, {transform_indices = @transform_6, window_bounds = array<i64: 8, 512>}, {transform_indices = @transform_7, window_bounds = array<i64: 4, 392>}]} {
    %c0 = arith.constant 0 : index
    %c0_0 = arith.constant 0 : index
    %0 = vector.load %arg1[%c0, %c0_0] : memref<8x196xf32, #tpu.memory_space<vmem>>, vector<8x196xf32>
    %c0_1 = arith.constant 0 : index
    %c0_2 = arith.constant 0 : index
    %1 = vector.load %arg3[%c0_1, %c0_2] : memref<196x512xf32, #tpu.memory_space<vmem>>, vector<196x512xf32>
    %cst = arith.constant dense<0.000000e+00> : vector<8x512xf32>
    %2 = tpu.matmul %0, %1, %cst {dimension_numbers = #tpu.dot_dimension_numbers<[1], [0], [0], [1], [0, 0, 1, 1], [], []>} : vector<8x196xf32>, vector<196x512xf32>, vector<8x512xf32> -> vector<8x512xf32>
    %c0_3 = arith.constant 0 : index
    %c0_4 = arith.constant 0 : index
    %3 = vector.load %arg4[%c0_3, %c0_4] : memref<1x512xf32, #tpu.memory_space<vmem>>, vector<1x512xf32>
    %4 = vector.broadcast %3 : vector<1x512xf32> to vector<8x512xf32>
    %5 = arith.addf %2, %4 : vector<8x512xf32>
    %c0_5 = arith.constant 0 : index
    %c0_6 = arith.constant 0 : index
    %6 = vector.load %arg7[%c0_5, %c0_6] : memref<8x512xf32, #tpu.memory_space<vmem>>, vector<8x512xf32>
    tpu.vector_store %arg7[%c0_5, %c0_6], %5 {strides = array<i32>} : memref<8x512xf32, #tpu.memory_space<vmem>>, vector<8x512xf32>,
    %c0_7 = arith.constant 0 : index
    %c0_8 = arith.constant 0 : index
    %7 = vector.load %arg2[%c0_7, %c0_8] : memref<4x392xf32, #tpu.memory_space<vmem>>, vector<4x392xf32>
    %cst_9 = arith.constant 5.000000e-01 : f32
    %8 = vector.broadcast %cst_9 : f32 to vector<4x392xf32>
    %9 = arith.mulf %7, %8 : vector<4x392xf32>
    %cst_10 = arith.constant 0.785398185 : f32
    %10 = vector.broadcast %cst_10 : f32 to vector<4x392xf32>
    %11 = arith.addf %9, %10 : vector<4x392xf32>
    %12 = math.cos %11 : vector<4x392xf32>
    %13 = math.sin %11 : vector<4x392xf32>
    %14 = vector.extract_strided_slice %12 {offsets = [1, 0], sizes = [1, 392], strides = [1, 1]} : vector<4x392xf32> to vector<1x392xf32>
    %15 = vector.extract_strided_slice %13 {offsets = [1, 0], sizes = [1, 392], strides = [1, 1]} : vector<4x392xf32> to vector<1x392xf32>
    %16 = tpu.concatenate %14, %15 in 0 : vector<1x392xf32>, vector<1x392xf32> -> vector<2x392xf32>
    %17 = vector.extract_strided_slice %12 {offsets = [0, 0], sizes = [1, 392], strides = [1, 1]} : vector<4x392xf32> to vector<1x392xf32>
    %18 = vector.broadcast %17 : vector<1x392xf32> to vector<2x392xf32>
    %19 = arith.mulf %18, %16 : vector<2x392xf32>
    %20 = vector.extract_strided_slice %13 {offsets = [0, 0], sizes = [1, 392], strides = [1, 1]} : vector<4x392xf32> to vector<1x392xf32>
    %21 = vector.broadcast %20 : vector<1x392xf32> to vector<2x392xf32>
    %22 = arith.mulf %21, %16 : vector<2x392xf32>
    %23 = tpu.concatenate %19, %22 in 0 : vector<2x392xf32>, vector<2x392xf32> -> vector<4x392xf32>
    %24 = vector.extract_strided_slice %12 {offsets = [3, 0], sizes = [1, 392], strides = [1, 1]} : vector<4x392xf32> to vector<1x392xf32>
    %25 = vector.extract_strided_slice %13 {offsets = [3, 0], sizes = [1, 392], strides = [1, 1]} : vector<4x392xf32> to vector<1x392xf32>
    %26 = tpu.concatenate %24, %25 in 0 : vector<1x392xf32>, vector<1x392xf32> -> vector<2x392xf32>
    %27 = vector.extract_strided_slice %12 {offsets = [2, 0], sizes = [1, 392], strides = [1, 1]} : vector<4x392xf32> to vector<1x392xf32>
    %28 = vector.broadcast %27 : vector<1x392xf32> to vector<2x392xf32>
    %29 = arith.mulf %28, %26 : vector<2x392xf32>
    %30 = vector.extract_strided_slice %13 {offsets = [2, 0], sizes = [1, 392], strides = [1, 1]} : vector<4x392xf32> to vector<1x392xf32>
    %31 = vector.broadcast %30 : vector<1x392xf32> to vector<2x392xf32>
    %32 = arith.mulf %31, %26 : vector<2x392xf32>
    %33 = tpu.concatenate %29, %32 in 0 : vector<2x392xf32>, vector<2x392xf32> -> vector<4x392xf32>
    %34 = vector.extract_strided_slice %23 {offsets = [0, 0], sizes = [1, 392], strides = [1, 1]} : vector<4x392xf32> to vector<1x392xf32>
    %35 = vector.broadcast %34 : vector<1x392xf32> to vector<4x392xf32>
    %36 = arith.mulf %35, %33 : vector<4x392xf32>
    %37 = vector.extract_strided_slice %23 {offsets = [1, 0], sizes = [1, 392], strides = [1, 1]} : vector<4x392xf32> to vector<1x392xf32>
    %38 = vector.broadcast %37 : vector<1x392xf32> to vector<4x392xf32>
    %39 = arith.mulf %38, %33 : vector<4x392xf32>
    %40 = vector.extract_strided_slice %23 {offsets = [2, 0], sizes = [1, 392], strides = [1, 1]} : vector<4x392xf32> to vector<1x392xf32>
    %41 = vector.broadcast %40 : vector<1x392xf32> to vector<4x392xf32>
    %42 = arith.mulf %41, %33 : vector<4x392xf32>
    %43 = vector.extract_strided_slice %23 {offsets = [3, 0], sizes = [1, 392], strides = [1, 1]} : vector<4x392xf32> to vector<1x392xf32>
    %44 = vector.broadcast %43 : vector<1x392xf32> to vector<4x392xf32>
    %45 = arith.mulf %44, %33 : vector<4x392xf32>
    %46 = tpu.concatenate %36, %39, %42, %45 in 0 : vector<4x392xf32>, vector<4x392xf32>, vector<4x392xf32>, vector<4x392xf32> -> vector<16x392xf32>
    %c0_11 = arith.constant 0 : index
    %c0_12 = arith.constant 0 : index
    %47 = vector.load %arg5[%c0_11, %c0_12] : memref<32x16xf32, #tpu.memory_space<vmem>>, vector<32x16xf32>
    %cst_13 = arith.constant dense<0.000000e+00> : vector<32x392xf32>
    %48 = tpu.matmul %47, %46, %cst_13 {dimension_numbers = #tpu.dot_dimension_numbers<[1], [0], [0], [1], [0, 0, 1, 1], [], []>} : vector<32x16xf32>, vector<16x392xf32>, vector<32x392xf32> -> vector<32x392xf32>
    %49 = arith.mulf %48, %48 : vector<32x392xf32>
    %c0_14 = arith.constant 0 : index
    %c0_15 = arith.constant 0 : index
    %50 = vector.load %arg6[%c0_14, %c0_15] : memref<4x32xf32, #tpu.memory_space<vmem>>, vector<4x32xf32>
    %cst_16 = arith.constant dense<0.000000e+00> : vector<4x392xf32>
    %51 = tpu.matmul %50, %49, %cst_16 {dimension_numbers = #tpu.dot_dimension_numbers<[1], [0], [0], [1], [0, 0, 1, 1], [], []>} : vector<4x32xf32>, vector<32x392xf32>, vector<4x392xf32> -> vector<4x392xf32>
    %c0_17 = arith.constant 0 : index
    %c0_18 = arith.constant 0 : index
    %52 = vector.load %arg8[%c0_17, %c0_18] : memref<4x392xf32, #tpu.memory_space<vmem>>, vector<4x392xf32>
    tpu.vector_store %arg8[%c0_17, %c0_18], %51 {strides = array<i32>} : memref<4x392xf32, #tpu.memory_space<vmem>>, vector<4x392xf32>,
    return
  }
  func.func @transform_0(%arg0: i32) -> (i32, i32) {
    %c0_i32 = arith.constant 0 : i32
    %c0_i32_0 = arith.constant 0 : i32
    return %arg0, %c0_i32 : i32, i32
  }
  func.func @transform_1(%arg0: i32) -> (i32, i32) {
    %c0_i32 = arith.constant 0 : i32
    %c0_i32_0 = arith.constant 0 : i32
    return %c0_i32, %arg0 : i32, i32
  }
  func.func @transform_2(%arg0: i32) -> (i32, i32) {
    %c0_i32 = arith.constant 0 : i32
    %c0_i32_0 = arith.constant 0 : i32
    %c0_i32_1 = arith.constant 0 : i32
    return %c0_i32, %c0_i32_0 : i32, i32
  }
  func.func @transform_3(%arg0: i32) -> (i32, i32) {
    %c0_i32 = arith.constant 0 : i32
    %c0_i32_0 = arith.constant 0 : i32
    %c0_i32_1 = arith.constant 0 : i32
    return %c0_i32, %c0_i32_0 : i32, i32
  }
  func.func @transform_4(%arg0: i32) -> (i32, i32) {
    %c0_i32 = arith.constant 0 : i32
    %c0_i32_0 = arith.constant 0 : i32
    %c0_i32_1 = arith.constant 0 : i32
    return %c0_i32, %c0_i32_0 : i32, i32
  }
  func.func @transform_5(%arg0: i32) -> (i32, i32) {
    %c0_i32 = arith.constant 0 : i32
    %c0_i32_0 = arith.constant 0 : i32
    %c0_i32_1 = arith.constant 0 : i32
    return %c0_i32, %c0_i32_0 : i32, i32
  }
  func.func @transform_6(%arg0: i32) -> (i32, i32) {
    %c0_i32 = arith.constant 0 : i32
    %c0_i32_0 = arith.constant 0 : i32
    return %arg0, %c0_i32 : i32, i32
  }
  func.func @transform_7(%arg0: i32) -> (i32, i32) {
    %c0_i32 = arith.constant 0 : i32
    %c0_i32_0 = arith.constant 0 : i32
    return %c0_i32, %arg0 : i32, i32
  }
}

</mosaic_0001>

<bundles_post_ra>
// kernel: sin.3
= control target key start
LH: loop header
LB: loop body
LE: loop exit
PB: predicated region body
PF: predicated region fallthrough
CT: control target
= control target key end

     0   :  { %v126_v12 = vmov 683565275   ;;  %v127_v14 = vmov 2475754826   ;;  %v128_v16 = vmov 2131351028   ;;  %s169_s0 = inlined_call_operand.vmem [shape: f32[16], index: 0, kind: input, shape index: {}]   ;;  %s170_s1 = inlined_call_operand.vmem [shape: f32[16], index: 1, kind: output, shape index: {}]  }
   0x1   :  { %v145_v0 = vld [vmem:[%s169_s0] sm:$0x1]  ;;  %v129_v18 = vmov 2102212464   ;;  %v130_v20 = vmov 920167782  }
   0x2   :  { %v6_v1 = vand.u32 2139095040, %v145_v0  ;;  %v3_v3 = vand.u32 2147483647, %v145_v0  ;;  %v131_v27 = vmov 1326507024   ;;  %vm5_vm7 = vcmp.lt.s32.totalorder %v145_v0, 0 }
   0x3   :  { %vm95_vm12 = vweird.f32 %v145_v0 }
   0x4   :  { %v7_v2 = vshrl.u32 %v6_v1, 23  ;;  %v10_v6 = vand.u32 8388607, %v3_v3  ;;  %vm4_vm8 = vcmp.le.f32.partialorder %v3_v3, 0.7853982 }
   0x6   :  { %v108_v4 = vadd.s32 4294967169, %v7_v2  ;;  %v11_v9 = vor.u32 8388608, %v10_v6 }
   0x8   :  { %v13_v5 = vadd.s32 1, %v108_v4  ;;  %v51_v29 = vshll.u32 %v11_v9, 8 }
   0xa   :  { %vm14_vm0 = vcmp.gt.s32.totalorder %v13_v5, 0 }
   0xb   :  { %v15_v7 = vsel %vm14_vm0, %v13_v5, 0 }
   0xc   :  { %v17_v8 = vand.u32 31, %v15_v7  ;;  %v16_v10 = vshrl.u32 %v15_v7, 5 }
   0xe   :  { %v18_v11 = vsub.s32 32, %v17_v8  ;;  %v20_v13 = vshll.u32 %v126_v12, %v17_v8  ;;  %v23_v15 = vshll.u32 %v127_v14, %v17_v8  ;;  %v26_v17 = vshll.u32 %v128_v16, %v17_v8 }
   0xf   :  { %v29_v19 = vshll.u32 %v129_v18, %v17_v8  ;;  %v32_v21 = vshll.u32 %v130_v20, %v17_v8  ;;  %vm35_vm1 = vcmp.lt.s32.totalorder %v16_v10, 1  ;;  %vm38_vm2 = vcmp.lt.s32.totalorder %v16_v10, 4 }
  0x10   :  { %v19_v22 = vshrl.u32 %v126_v12, %v18_v11  ;;  %v21_v23 = vshrl.u32 %v127_v14, %v18_v11  ;;  %v24_v24 = vshrl.u32 %v128_v16, %v18_v11  ;;  %v27_v25 = vshrl.u32 %v129_v18, %v18_v11 }
  0x11   :  { %v30_v26 = vshrl.u32 %v130_v20, %v18_v11  ;;  %v33_v28 = vshrl.u32 %v131_v27, %v18_v11  ;;  %vm36_vm3 = vcmp.lt.s32.totalorder %v16_v10, 2  ;;  %vm37_vm4 = vcmp.lt.s32.totalorder %v16_v10, 3 }
  0x12   :  { %v22_v30 = vor.u32 %v21_v23, %v20_v13  ;;  %v25_v31 = vor.u32 %v24_v24, %v23_v15  ;;  %v28_v32 = vor.u32 %v27_v25, %v26_v17 }
  0x13   :  { %v31_v33 = vor.u32 %v30_v26, %v29_v19  ;;  %v34_v34 = vor.u32 %v33_v28, %v32_v21 }
  0x14   :  { %v39_v35 = vsel %vm35_vm1, %v19_v22, %v22_v30  ;;  %v40_v36 = vsel %vm38_vm2, %v28_v32, 2102212464  ;;  %v43_v37 = vsel %vm35_vm1, %v22_v30, %v25_v31  ;;  %v47_v38 = vsel %vm35_vm1, %v25_v31, %v28_v32 }
  0x15   :  { %v41_v39 = vsel %vm37_vm4, %v25_v31, %v40_v36  ;;  %v44_v40 = vsel %vm38_vm2, %v31_v33, 920167782  ;;  %v48_v41 = vsel %vm38_vm2, %v34_v34, 1326507024 }
  0x16   :  { %v45_v42 = vsel %vm37_vm4, %v28_v32, %v44_v40  ;;  %v49_v43 = vsel %vm37_vm4, %v31_v33, %v48_v41  ;;  %v42_v44 = vsel %vm36_vm3, %v39_v35, %v41_v39 }
  0x17   :  { %v46_v45 = vsel %vm36_vm3, %v43_v37, %v45_v42  ;;  %v50_v46 = vsel %vm36_vm3, %v47_v38, %v49_v43  ;;  %v58_v51 = vmul.u32 %v51_v29, %v42_v44 }
  0x18   :  { %v151_v47 = vmul.u32.u64.low %v51_v29, %v50_v46  ;;  %v152_v48 = vmul.u32.u64.high %v51_v29, %v50_v46, %v151_v47  ;;  %v154_v49 = vmul.u32.u64.low %v51_v29, %v46_v45  ;;  %v155_v50 = vmul.u32.u64.high %v51_v29, %v46_v45, %v154_v49 }
  0x1a   :  { %vm60_vm5 = vc.u32 %v152_v48, %v154_v49  ;;  %v61_v52 = vadd.s32 1, %v155_v50  ;;  %v59_v63 = vadd.s32 %v154_v49, %v152_v48 }
  0x1c   :  { %v62_v53 = vsel %vm60_vm5, %v61_v52, %v155_v50 }
  0x1d   :  { %v63_v54 = vadd.s32 %v62_v53, %v58_v51 }
  0x1f   :  { %v64_v55 = vadd.s32 536870912, %v63_v54 }
  0x21   :  { %v65_v56 = vshrl.u32 %v64_v55, 30 }
  0x23   :  { %v66_v57 = vshll.u32 %v65_v56, 30  ;;  %v89_v14 = vsub.s32 4, %v65_v56 }
  0x25   :  { %v67_v58 = vsub.s32 %v63_v54, %v66_v57  ;;  %v90_v16 = vsel %vm5_vm7, %v89_v14, %v65_v56 }
  0x26   :  { %v92_v18 = vsel %vm4_vm8, 0, %v90_v16 }
  0x27   :  { %v69_v59 = vsub.s32 0, %v67_v58  ;;  %v96_v19 = vadd.s32 3, %v92_v18 }
  0x29   :  { %v109_v60 = vmin.u32 %v69_v59, %v67_v58  ;;  %v97_v20 = vand.u32 3, %v96_v19 }
  0x2b   :  { %v71_v61 = vclz %v109_v60  ;;  %vm102_vm9 = vcmp.eq.s32.totalorder %v97_v20, 2  ;;  %vm99_vm10 = vcmp.eq.s32.totalorder %v97_v20, 0  ;;  %vm98_vm11 = vcmp.lt.s32.totalorder %v97_v20, 2 }
  0x2d   :  { %v110_v62 = vadd.s32 4294967294, %v71_v61 }
  0x2f   :  { %vm111_vm6 = vcmp.lt.s32.totalorder %v110_v62, 0 }
  0x30   :  { %v74_v1 = vsel %vm111_vm6, 0, %v110_v62 }
  0x31   :  { %v75_v2 = vsub.s32 32, %v74_v1  ;;  %v76_v4 = vshll.u32 %v67_v58, %v74_v1  ;;  %v79_v5 = vsub.s32 4294967266, %v74_v1 }
  0x33   :  { %v77_v6 = vshrl.u32 %v59_v63, %v75_v2  ;;  %v80_v7 = vadd.s32 127, %v79_v5 }
  0x35   :  { %v78_v8 = vor.u32 %v77_v6, %v76_v4  ;;  %v81_v9 = vshll.u32 %v80_v7, 23 }
  0x37   :  { %v82_v10 = vor.u32 4788187, %v81_v9  ;;  %v85_v11 = vcvt.s32.f32 %v78_v8 }
  0x39   :  { %v83_v12 = vand.u32 2147483647, %v82_v10 }
  0x3b   :  { %v86_v13 = vmul.f32 %v85_v11, %v83_v12 }
  0x3d   :  { %v87_v3 = vxor.u32 2147483648, %v86_v13 }
  0x3f   :  { %v88_v15 = vsel %vm5_vm7, %v87_v3, %v86_v13 }
  0x40   :  { %v91_v17 = vsel %vm4_vm8, %v145_v0, %v88_v15 }
  0x41   :  { %122 = vcosq.f32 %v91_v17 }
  0x42   :  { %124 = vsinq.f32 %v91_v17 }
  0x4e   :  { %v123_v21 = vpop.eup %122 }
  0x4f   :  { %v125_v22 = vpop.eup %124  ;;  %v103_v23 = vxor.u32 2147483648, %v123_v21 }
  0x50   :  { %v100_v24 = vxor.u32 2147483648, %v125_v22 }
  0x51   :  { %v104_v0 = vsel %vm102_vm9, %v103_v23, %v125_v22 }
  0x52   :  { %v101_v25 = vsel %vm99_vm10, %v123_v21, %v100_v24 }
  0x53   :  { %v105_v26 = vsel %vm98_vm11, %v101_v25, %v104_v0 }
  0x54   :  { %v106_v27 = vsel %vm95_vm12, nan, %v105_v26 }
  0x55   :  { %107 = vst [vmem:[%s170_s1] sm:$0x1] %v106_v27 }

// kernel: inception_forward.1
= control target key start
LH: loop header
LB: loop body
LE: loop exit
PB: predicated region body
PF: predicated region fallthrough
CT: control target
= control target key end

     0   :  { %vm153_vm0 = vcmask 1043456   ;;  %vm149_vm1 = vcmask 556032   ;;  %s2234_s2 = inlined_call_operand.vmem [shape: f32[196,512], index: 2, kind: input, shape index: {}]   ;;  %s2235_s1 = inlined_call_operand.vmem [shape: f32[4,392], index: 1, kind: input, shape index: {}]   ;;  %s2236_s0 = inlined_call_operand.vmem [shape: f32[8,196], index: 0, kind: input, shape index: {}]   ;;  %s2237_s4 = inlined_call_operand.vmem [shape: f32[32,16], index: 4, kind: input, shape index: {}]   ;;  %s2238_s3 = inlined_call_operand.vmem [shape: f32[1,512], index: 3, kind: input, shape index: {}]   ;;  %s2239_s6 = inlined_call_operand.vmem [shape: f32[8,512], index: 6, kind: output, shape index: {0}]   ;;  %s2240_s5 = inlined_call_operand.vmem [shape: f32[4,32], index: 5, kind: input, shape index: {}]   ;;  %s2241_s7 = inlined_call_operand.vmem [shape: f32[4,392], index: 7, kind: output, shape index: {1}]  }
   0x1   :  { %v88_v0 = vld [vmem:[%s2234_s2 + $0x1e8] sm:$0xff]  ;;  %v90_v1 = vld [vmem:[%s2234_s2 + $0x1f8] sm:$0xff]  ;;  %v87_v2 = vld [vmem:[%s2234_s2 + $0x1e0] sm:$0xff] }
   0x2   :  { %166 = vmatprep.subr.mxu0 %v88_v0  ;;  %237 = vmatprep.subr.mxu1 %v90_v1  ;;  %v89_v3 = vld [vmem:[%s2234_s2 + $0x1f0] sm:$0xff]  ;;  %v84_v4 = vld [vmem:[%s2234_s2 + $0x1c8] sm:$0xff]  ;;  %v86_v5 = vld [vmem:[%s2234_s2 + $0x1d8] sm:$0xff] }
   0x3   :  { %167 = vmatpush1.msra.mxu0 %v87_v2  ;;  %238 = vmatpush1.msra.mxu1 %v89_v3  ;;  %v83_v6 = vld [vmem:[%s2234_s2 + $0x1c0] sm:$0xff]  ;;  %v85_v7 = vld [vmem:[%s2234_s2 + $0x1d0] sm:$0xff]  ;;  %v80_v8 = vld [vmem:[%s2234_s2 + $0x1a8] sm:$0xff] }
   0x4   :  { %168 = vmatprep.subr.mxu0 %v84_v4  ;;  %239 = vmatprep.subr.mxu1 %v86_v5  ;;  %v82_v9 = vld [vmem:[%s2234_s2 + $0x1b8] sm:$0xff]  ;;  %v79_v10 = vld [vmem:[%s2234_s2 + $0x1a0] sm:$0xff]  ;;  %v81_v11 = vld [vmem:[%s2234_s2 + $0x1b0] sm:$0xff] }
   0x5   :  { %169 = vmatpush1.msra.mxu0 %v83_v6  ;;  %240 = vmatpush1.msra.mxu1 %v85_v7  ;;  %v76_v12 = vld [vmem:[%s2234_s2 + $0x188] sm:$0xff]  ;;  %v78_v13 = vld [vmem:[%s2234_s2 + $0x198] sm:$0xff]  ;;  %v75_v14 = vld [vmem:[%s2234_s2 + $0x180] sm:$0xff] }
   0x6   :  { %170 = vmatprep.subr.mxu0 %v80_v8  ;;  %241 = vmatprep.subr.mxu1 %v82_v9  ;;  %v77_v15 = vld [vmem:[%s2234_s2 + $0x190] sm:$0xff]  ;;  %v72_v16 = vld [vmem:[%s2234_s2 + $0x168] sm:$0xff]  ;;  %v74_v17 = vld [vmem:[%s2234_s2 + $0x178] sm:$0xff] }
   0x7   :  { %171 = vmatpush1.msra.mxu0 %v79_v10  ;;  %242 = vmatpush1.msra.mxu1 %v81_v11  ;;  %v71_v18 = vld [vmem:[%s2234_s2 + $0x160] sm:$0xff]  ;;  %v73_v19 = vld [vmem:[%s2234_s2 + $0x170] sm:$0xff]  ;;  %v68_v20 = vld [vmem:[%s2234_s2 + $0x148] sm:$0xff] }
   0x8   :  { %172 = vmatprep.subr.mxu0 %v76_v12  ;;  %243 = vmatprep.subr.mxu1 %v78_v13  ;;  %v70_v21 = vld [vmem:[%s2234_s2 + $0x158] sm:$0xff]  ;;  %v67_v22 = vld [vmem:[%s2234_s2 + $0x140] sm:$0xff]  ;;  %v69_v23 = vld [vmem:[%s2234_s2 + $0x150] sm:$0xff] }
   0x9   :  { %173 = vmatpush1.msra.mxu0 %v75_v14  ;;  %244 = vmatpush1.msra.mxu1 %v77_v15  ;;  %v64_v24 = vld [vmem:[%s2234_s2 + $0x128] sm:$0xff]  ;;  %v66_v25 = vld [vmem:[%s2234_s2 + $0x138] sm:$0xff]  ;;  %v63_v26 = vld [vmem:[%s2234_s2 + $0x120] sm:$0xff] }
   0xa   :  { %174 = vmatprep.subr.mxu0 %v72_v16  ;;  %245 = vmatprep.subr.mxu1 %v74_v17  ;;  %v65_v27 = vld [vmem:[%s2234_s2 + $0x130] sm:$0xff]  ;;  %v60_v28 = vld [vmem:[%s2234_s2 + $0x108] sm:$0xff]  ;;  %v62_v29 = vld [vmem:[%s2234_s2 + $0x118] sm:$0xff] }
   0xb   :  { %175 = vmatpush1.msra.mxu0 %v71_v18  ;;  %246 = vmatpush1.msra.mxu1 %v73_v19  ;;  %v59_v30 = vld [vmem:[%s2234_s2 + $0x100] sm:$0xff]  ;;  %v61_v31 = vld [vmem:[%s2234_s2 + $0x110] sm:$0xff]  ;;  %v56_v32 = vld [vmem:[%s2234_s2 + $0xe8] sm:$0xff] }
   0xc   :  { %176 = vmatprep.subr.mxu0 %v68_v20  ;;  %247 = vmatprep.subr.mxu1 %v70_v21  ;;  %v58_v33 = vld [vmem:[%s2234_s2 + $0xf8] sm:$0xff]  ;;  %v55_v34 = vld [vmem:[%s2234_s2 + $0xe0] sm:$0xff]  ;;  %v57_v35 = vld [vmem:[%s2234_s2 + $0xf0] sm:$0xff] }
   0xd   :  { %177 = vmatpush1.msra.mxu0 %v67_v22  ;;  %248 = vmatpush1.msra.mxu1 %v69_v23  ;;  %v52_v36 = vld [vmem:[%s2234_s2 + $0xc8] sm:$0xff]  ;;  %v54_v37 = vld [vmem:[%s2234_s2 + $0xd8] sm:$0xff]  ;;  %v51_v38 = vld [vmem:[%s2234_s2 + $0xc0] sm:$0xff] }
   0xe   :  { %178 = vmatprep.subr.mxu0 %v64_v24  ;;  %249 = vmatprep.subr.mxu1 %v66_v25  ;;  %v53_v39 = vld [vmem:[%s2234_s2 + $0xd0] sm:$0xff]  ;;  %v48_v40 = vld [vmem:[%s2234_s2 + $0xa8] sm:$0xff]  ;;  %v50_v41 = vld [vmem:[%s2234_s2 + $0xb8] sm:$0xff] }
   0xf   :  { %179 = vmatpush1.msra.mxu0 %v63_v26  ;;  %250 = vmatpush1.msra.mxu1 %v65_v27  ;;  %v47_v42 = vld [vmem:[%s2234_s2 + $0xa0] sm:$0xff]  ;;  %v49_v43 = vld [vmem:[%s2234_s2 + $0xb0] sm:$0xff]  ;;  %v44_v44 = vld [vmem:[%s2234_s2 + $0x88] sm:$0xff] }
  0x10   :  { %180 = vmatprep.subr.mxu0 %v60_v28  ;;  %251 = vmatprep.subr.mxu1 %v62_v29  ;;  %v46_v45 = vld [vmem:[%s2234_s2 + $0x98] sm:$0xff]  ;;  %v43_v46 = vld [vmem:[%s2234_s2 + $0x80] sm:$0xff]  ;;  %v45_v47 = vld [vmem:[%s2234_s2 + $0x90] sm:$0xff] }
  0x11   :  { %181 = vmatpush1.msra.mxu0 %v59_v30  ;;  %252 = vmatpush1.msra.mxu1 %v61_v31  ;;  %v40_v48 = vld [vmem:[%s2234_s2 + $0x68] sm:$0xff]  ;;  %v42_v49 = vld [vmem:[%s2234_s2 + $0x78] sm:$0xff]  ;;  %v39_v50 = vld [vmem:[%s2234_s2 + $0x60] sm:$0xff] }
  0x12   :  { %182 = vmatprep.subr.mxu0 %v56_v32  ;;  %253 = vmatprep.subr.mxu1 %v58_v33  ;;  %v41_v51 = vld [vmem:[%s2234_s2 + $0x70] sm:$0xff]  ;;  %v36_v52 = vld [vmem:[%s2234_s2 + $0x48] sm:$0xff]  ;;  %v38_v53 = vld [vmem:[%s2234_s2 + $0x58] sm:$0xff] }
  0x13   :  { %183 = vmatpush1.msra.mxu0 %v55_v34  ;;  %254 = vmatpush1.msra.mxu1 %v57_v35  ;;  %v35_v54 = vld [vmem:[%s2234_s2 + $0x40] sm:$0xff]  ;;  %v37_v55 = vld [vmem:[%s2234_s2 + $0x50] sm:$0xff]  ;;  %v32_v56 = vld [vmem:[%s2234_s2 + $0x28] sm:$0xff] }
  0x14   :  { %184 = vmatprep.subr.mxu0 %v52_v36  ;;  %255 = vmatprep.subr.mxu1 %v54_v37  ;;  %v34_v57 = vld [vmem:[%s2234_s2 + $0x38] sm:$0xff]  ;;  %v31_v58 = vld [vmem:[%s2234_s2 + $0x20] sm:$0xff]  ;;  %v33_v59 = vld [vmem:[%s2234_s2 + $0x30] sm:$0xff] }
  0x15   :  { %185 = vmatpush1.msra.mxu0 %v51_v38  ;;  %256 = vmatpush1.msra.mxu1 %v53_v39  ;;  %v28_v60 = vld [vmem:[%s2234_s2 + $0x8] sm:$0xff]  ;;  %v30_v61 = vld [vmem:[%s2234_s2 + $0x18] sm:$0xff]  ;;  %v27_v62 = vld [vmem:[%s2234_s2] sm:$0xff] }
  0x16   :  { %186 = vmatprep.subr.mxu0 %v48_v40  ;;  %257 = vmatprep.subr.mxu1 %v50_v41  ;;  %v29_v63 = vld [vmem:[%s2234_s2 + $0x10] sm:$0xff]  ;;  %v124_v0 = vld [vmem:[%s2234_s2 + $0x308] sm:$0xf]  ;;  %v126_v1 = vld [vmem:[%s2234_s2 + $0x318] sm:$0xf] }
  0x17   :  { %187 = vmatpush1.msra.mxu0 %v47_v42  ;;  %258 = vmatpush1.msra.mxu1 %v49_v43  ;;  %v123_v2 = vld [vmem:[%s2234_s2 + $0x300] sm:$0xf]  ;;  %v125_v3 = vld [vmem:[%s2234_s2 + $0x310] sm:$0xf]  ;;  %v120_v4 = vld [vmem:[%s2234_s2 + $0x2e8] sm:$0xff] }
  0x18   :  { %188 = vmatprep.subr.mxu0 %v44_v44  ;;  %259 = vmatprep.subr.mxu1 %v46_v45  ;;  %v122_v5 = vld [vmem:[%s2234_s2 + $0x2f8] sm:$0xff]  ;;  %v119_v6 = vld [vmem:[%s2234_s2 + $0x2e0] sm:$0xff]  ;;  %v121_v7 = vld [vmem:[%s2234_s2 + $0x2f0] sm:$0xff] }
  0x19   :  { %189 = vmatpush1.msra.mxu0 %v43_v46  ;;  %260 = vmatpush1.msra.mxu1 %v45_v47  ;;  %v116_v8 = vld [vmem:[%s2234_s2 + $0x2c8] sm:$0xff]  ;;  %v118_v9 = vld [vmem:[%s2234_s2 + $0x2d8] sm:$0xff]  ;;  %v312_v10 = vld [vmem:[%s2235_s1] sm:$0xff] }
  0x1a   :  { %190 = vmatprep.subr.mxu0 %v40_v48  ;;  %261 = vmatprep.subr.mxu1 %v42_v49  ;;  %v313_v11 = vld [vmem:[%s2235_s1 + $0x8] sm:$0xff]  ;;  %v115_v12 = vld [vmem:[%s2234_s2 + $0x2c0] sm:$0xff]  ;;  %v117_v13 = vld [vmem:[%s2234_s2 + $0x2d0] sm:$0xff]  ;;  %v314_v14 = vmul.f32 0.5, %v312_v10  ;;  %v1567_v10 = vmov 920167782  }
  0x1b   :  { %191 = vmatpush1.msra.mxu0 %v39_v50  ;;  %262 = vmatpush1.msra.mxu1 %v41_v51  ;;  %v315_v15 = vmul.f32 0.5, %v313_v11  ;;  %v112_v16 = vld [vmem:[%s2234_s2 + $0x2a8] sm:$0xff]  ;;  %v114_v17 = vld [vmem:[%s2234_s2 + $0x2b8] sm:$0xff]  ;;  %v111_v18 = vld [vmem:[%s2234_s2 + $0x2a0] sm:$0xff] }
  0x1c   :  { %192 = vmatprep.subr.mxu0 %v36_v52  ;;  %263 = vmatprep.subr.mxu1 %v38_v53  ;;  %v113_v19 = vld [vmem:[%s2234_s2 + $0x2b0] sm:$0xff]  ;;  %v1860_v20 = vadd.f32 0.7853982, %v314_v14  ;;  %v108_v22 = vld [vmem:[%s2234_s2 + $0x288] sm:$0xff]  ;;  %v110_v23 = vld [vmem:[%s2234_s2 + $0x298] sm:$0xff] }
  0x1d   :  { %193 = vmatpush1.msra.mxu0 %v35_v54  ;;  %264 = vmatpush1.msra.mxu1 %v37_v55  ;;  %v1862_v21 = vadd.f32 0.7853982, %v315_v15  ;;  %v107_v24 = vld [vmem:[%s2234_s2 + $0x280] sm:$0xff]  ;;  %v109_v25 = vld [vmem:[%s2234_s2 + $0x290] sm:$0xff]  ;;  %v104_v28 = vld [vmem:[%s2234_s2 + $0x268] sm:$0xff] }
  0x1e   :  { %194 = vmatprep.subr.mxu0 %v32_v56  ;;  %265 = vmatprep.subr.mxu1 %v34_v57  ;;  %v318_v26 = vand.u32 2147483647, %v1860_v20  ;;  %v321_v27 = vand.u32 2139095040, %v1860_v20  ;;  %v106_v29 = vld [vmem:[%s2234_s2 + $0x278] sm:$0xff]  ;;  %v103_v32 = vld [vmem:[%s2234_s2 + $0x260] sm:$0xff]  ;;  %v105_v33 = vld [vmem:[%s2234_s2 + $0x270] sm:$0xff] }
  0x1f   :  { %195 = vmatpush1.msra.mxu0 %v31_v58  ;;  %266 = vmatpush1.msra.mxu1 %v33_v59  ;;  %v421_v30 = vand.u32 2147483647, %v1862_v21  ;;  %v424_v31 = vand.u32 2139095040, %v1862_v21  ;;  %v100_v34 = vld [vmem:[%s2234_s2 + $0x248] sm:$0xff]  ;;  %v102_v36 = vld [vmem:[%s2234_s2 + $0x258] sm:$0xff]  ;;  %v99_v40 = vld [vmem:[%s2234_s2 + $0x240] sm:$0xff] }
  0x20   :  { %196 = vmatprep.subr.mxu0 %v28_v60  ;;  %267 = vmatprep.subr.mxu1 %v30_v61  ;;  %v322_v35 = vshrl.u32 %v321_v27, 23  ;;  %v325_v37 = vand.u32 8388607, %v318_v26  ;;  %v101_v41 = vld [vmem:[%s2234_s2 + $0x250] sm:$0xff]  ;;  %v96_v43 = vld [vmem:[%s2234_s2 + $0x228] sm:$0xff]  ;;  %v98_v44 = vld [vmem:[%s2234_s2 + $0x238] sm:$0xff] }
  0x21   :  { %197 = vmatpush1.msra.mxu0 %v27_v62  ;;  %268 = vmatpush1.msra.mxu1 %v29_v63  ;;  %v425_v38 = vshrl.u32 %v424_v31, 23  ;;  %v428_v39 = vand.u32 8388607, %v421_v30  ;;  %v95_v46 = vld [vmem:[%s2234_s2 + $0x220] sm:$0xff]  ;;  %v97_v47 = vld [vmem:[%s2234_s2 + $0x230] sm:$0xff]  ;;  %v92_v49 = vld [vmem:[%s2234_s2 + $0x208] sm:$0xff] }
  0x22   :  { %1508 = vmatprep.subr.msk.mxu0 %vm153_vm0, %v124_v0  ;;  %1511 = vmatprep.subr.msk.mxu1 %vm153_vm0, %v126_v1  ;;  %v1514_v42 = vadd.s32 4294967169, %v322_v35  ;;  %v94_v50 = vld [vmem:[%s2234_s2 + $0x218] sm:$0xff]  ;;  %v326_v51 = vor.u32 8388608, %v325_v37  ;;  %v91_v54 = vld [vmem:[%s2234_s2 + $0x200] sm:$0xff]  ;;  %v26_v55 = vld [vmem:[%s2236_s0 + $0x8] sm:$0xff] }
  0x23   :  { %1509 = vmatpush2.msk.msra.mxu0 %vm153_vm0, %v123_v2  ;;  %1512 = vmatpush2.msk.msra.mxu1 %vm153_vm0, %v125_v3  ;;  %v1518_v45 = vadd.s32 4294967169, %v425_v38  ;;  %v429_v52 = vor.u32 8388608, %v428_v39  ;;  %v93_v56 = vld [vmem:[%s2234_s2 + $0x210] sm:$0xff]  ;;  %v25_v58 = vld [vmem:[%s2236_s0] sm:$0xff]  ;;  %v1563_v2 = vmov 683565275  }
  0x24   :  { %214 = vmatprep.subr.mxu0 %v120_v4  ;;  %285 = vmatprep.subr.mxu1 %v122_v5  ;;  %v328_v48 = vadd.s32 1, %v1514_v42  ;;  %v1939_v62 = vshll.u32 %v326_v51, 8  ;;  %v1564_v4 = vmov 2475754826  }
  0x25   :  { %215 = vmatpush2.msra.mxu0 %v119_v6  ;;  %286 = vmatpush2.msra.mxu1 %v121_v7  ;;  %v431_v53 = vadd.s32 1, %v1518_v45  ;;  %v1943_v0 = vshll.u32 %v429_v52, 8  ;;  %v1565_v6 = vmov 2131351028  }
  0x26   :  { %216 = vmatprep.subr.mxu0 %v116_v8  ;;  %287 = vmatprep.subr.mxu1 %v118_v9  ;;  %vm329_vm2 = vcmp.gt.s32.totalorder %v328_v48, 0  ;;  %v1566_v8 = vmov 2102212464  }
  0x27   :  { %217 = vmatpush2.msra.mxu0 %v115_v12  ;;  %288 = vmatpush2.msra.mxu1 %v117_v13  ;;  %v330_v57 = vsel %vm329_vm2, %v328_v48, 0  ;;  %vm432_vm3 = vcmp.gt.s32.totalorder %v431_v53, 0  ;;  %vm319_vm2 = vcmp.le.f32.partialorder %v318_v26, 0.7853982 }
  0x28   :  { %218 = vmatprep.subr.mxu0 %v112_v16  ;;  %289 = vmatprep.subr.mxu1 %v114_v17  ;;  %v331_v59 = vshrl.u32 %v330_v57, 5  ;;  %v332_v60 = vand.u32 31, %v330_v57  ;;  %v433_v61 = vsel %vm432_vm3, %v431_v53, 0  ;;  %v1568_v17 = vmov 0.0  }
  0x29   :  { %219 = vmatpush2.msra.mxu0 %v111_v18  ;;  %290 = vmatpush2.msra.mxu1 %v113_v19  ;;  %v1941_v63 = vand.u32 31, %v433_v61  ;;  %v1946_v12 = vshrl.u32 %v433_v61, 5  ;;  %v1569_v19 = vmov 1326507024   ;;  %vm423_vm3 = vcmp.lt.s32.totalorder %v1862_v21, 0 }
  0x2a   :  { %220 = vmatprep.subr.mxu0 %v108_v22  ;;  %291 = vmatprep.subr.mxu1 %v110_v23  ;;  %v333_v1 = vsub.s32 32, %v332_v60  ;;  %v335_v3 = vshll.u32 %v1563_v2, %v332_v60  ;;  %v338_v5 = vshll.u32 %v1564_v4, %v332_v60  ;;  %v341_v7 = vshll.u32 %v1565_v6, %v332_v60 }
  0x2b   :  { %221 = vmatpush2.msra.mxu0 %v107_v24  ;;  %292 = vmatpush2.msra.mxu1 %v109_v25  ;;  %v344_v9 = vshll.u32 %v1566_v8, %v332_v60  ;;  %v347_v11 = vshll.u32 %v1567_v10, %v332_v60  ;;  %vm350_vm4 = vcmp.lt.s32.totalorder %v331_v59, 1  ;;  %vm351_vm5 = vcmp.lt.s32.totalorder %v331_v59, 2 }
  0x2c   :  { %222 = vmatprep.subr.mxu0 %v104_v28  ;;  %293 = vmatprep.subr.mxu1 %v106_v29  ;;  %v334_v13 = vshrl.u32 %v1563_v2, %v333_v1  ;;  %v336_v14 = vshrl.u32 %v1564_v4, %v333_v1  ;;  %v339_v15 = vshrl.u32 %v1565_v6, %v333_v1  ;;  %vm353_vm6 = vcmp.lt.s32.totalorder %v331_v59, 4 }
  0x2d   :  { %223 = vmatpush2.msra.mxu0 %v103_v32  ;;  %294 = vmatpush2.msra.mxu1 %v105_v33  ;;  %v342_v16 = vshrl.u32 %v1566_v8, %v333_v1  ;;  %v345_v18 = vshrl.u32 %v1567_v10, %v333_v1  ;;  %v348_v22 = vshrl.u32 %v1569_v19, %v333_v1  ;;  %v436_v27 = vsub.s32 32, %v1941_v63 }
  0x2e   :  { %224 = vmatprep.subr.mxu0 %v100_v34  ;;  %295 = vmatprep.subr.mxu1 %v102_v36  ;;  %v337_v23 = vor.u32 %v336_v14, %v335_v3  ;;  %v340_v24 = vor.u32 %v339_v15, %v338_v5  ;;  %vm352_vm7 = vcmp.lt.s32.totalorder %v331_v59, 3  ;;  %v438_v31 = vshll.u32 %v1563_v2, %v1941_v63 }
  0x2f   :  { %225 = vmatpush2.msra.mxu0 %v99_v40  ;;  %296 = vmatpush2.msra.mxu1 %v101_v41  ;;  %v343_v25 = vor.u32 %v342_v16, %v341_v7  ;;  %v346_v28 = vor.u32 %v345_v18, %v344_v9  ;;  %v349_v29 = vor.u32 %v348_v22, %v347_v11  ;;  %vm453_vm8 = vcmp.lt.s32.totalorder %v1946_v12, 1 }
  0x30   :  { %226 = vmatprep.subr.mxu0 %v96_v43  ;;  %297 = vmatprep.subr.mxu1 %v98_v44  ;;  %v354_v32 = vsel %vm350_vm4, %v334_v13, %v337_v23  ;;  %v358_v34 = vsel %vm350_vm4, %v337_v23, %v340_v24  ;;  %v441_v39 = vshll.u32 %v1564_v4, %v1941_v63  ;;  %vm454_vm9 = vcmp.lt.s32.totalorder %v1946_v12, 2 }
  0x31   :  { %227 = vmatpush2.msra.mxu0 %v95_v46  ;;  %298 = vmatpush2.msra.mxu1 %v97_v47  ;;  %v355_v33 = vsel %vm353_vm6, %v343_v25, 2102212464  ;;  %v362_v35 = vsel %vm350_vm4, %v340_v24, %v343_v25  ;;  %v359_v37 = vsel %vm353_vm6, %v346_v28, 920167782  ;;  %v363_v38 = vsel %vm353_vm6, %v349_v29, 1326507024 }
  0x32   :  { %228 = vmatprep.subr.mxu0 %v92_v49  ;;  %299 = vmatprep.subr.mxu1 %v94_v50  ;;  %v356_v36 = vsel %vm352_vm7, %v340_v24, %v355_v33  ;;  %v360_v40 = vsel %vm352_vm7, %v343_v25, %v359_v37  ;;  %v364_v41 = vsel %vm352_vm7, %v346_v28, %v363_v38  ;;  %vm455_vm11 = vcmp.lt.s32.totalorder %v1946_v12, 3 }
  0x33   :  { %229 = vmatpush2.msra.mxu0 %v91_v54  ;;  %1510 = vmatprep.mubr.msk.f32.mxu0 %vm149_vm1, %v26_v55  ;;  %v437_v42 = vshrl.u32 %v1563_v2, %v436_v27  ;;  %v439_v43 = vshrl.u32 %v1564_v4, %v436_v27  ;;  %v357_v44 = vsel %vm351_vm5, %v354_v32, %v356_v36  ;;  %vm456_vm12 = vcmp.lt.s32.totalorder %v1946_v12, 4 }
  0x34   :  { %300 = vmatpush2.msra.mxu1 %v93_v56  ;;  %1513 = vmatprep.mubr.msk.f32.mxu1 %vm149_vm1, %v26_v55  ;;  %v361_v45 = vsel %vm351_vm5, %v358_v34, %v360_v40  ;;  %v365_v46 = vsel %vm351_vm5, %v362_v35, %v364_v41  ;;  %v442_v47 = vshrl.u32 %v1565_v6, %v436_v27  ;;  %vm320_vm1 = vcmp.lt.s32.totalorder %v1860_v20, 0 }
  0x35   :  { %231 = vmatmul.mubr.f32.vlgmr.msra.gmra.mxu0 %v25_v58  ;;  %302 = vmatmul.mubr.f32.vlgmr.msra.gmra.mxu1 %v25_v58  ;;  %v1963_v48 = vmul.u32.u64.low %v1939_v62, %v365_v46  ;;  %v1964_v49 = vmul.u32.u64.high %v1939_v62, %v365_v46, %v1963_v48  ;;  %v1967_v50 = vmul.u32.u64.low %v1939_v62, %v361_v45  ;;  %v1968_v51 = vmul.u32.u64.high %v1939_v62, %v361_v45, %v1967_v50 }
  0x36   :  { %1211 = vmatprep.mubr.f32.mxu0 %v1568_v17  ;;  %1300 = vmatprep.mubr.f32.mxu1 %v1568_v17  ;;  %v440_v52 = vor.u32 %v439_v43, %v438_v31  ;;  %v443_v53 = vor.u32 %v442_v47, %v441_v39  ;;  %v444_v54 = vshll.u32 %v1565_v6, %v1941_v63  ;;  %vm422_vm4 = vcmp.le.f32.partialorder %v421_v30, 0.7853982 }
  0x37   :  { %v445_v55 = vshrl.u32 %v1566_v8, %v436_v27  ;;  %v447_v56 = vshll.u32 %v1566_v8, %v1941_v63  ;;  %v448_v57 = vshrl.u32 %v1567_v10, %v436_v27  ;;  %v450_v58 = vshll.u32 %v1567_v10, %v1941_v63 }
  0x38   :  { %v451_v59 = vshrl.u32 %v1569_v19, %v436_v27  ;;  %v373_v60 = vmul.u32 %v1939_v62, %v357_v44  ;;  %vm375_vm10 = vc.u32 %v1964_v49, %v1967_v50  ;;  %v376_v1 = vadd.s32 1, %v1968_v51 }
  0x39   :  { %v446_v61 = vor.u32 %v445_v55, %v444_v54  ;;  %v449_v2 = vor.u32 %v448_v57, %v447_v56  ;;  %v457_v4 = vsel %vm453_vm8, %v437_v42, %v440_v52  ;;  %v461_v63 = vsel %vm453_vm8, %v440_v52, %v443_v53 }
  0x3a   :  { %v452_v3 = vor.u32 %v451_v59, %v450_v58  ;;  %v377_v5 = vsel %vm375_vm10, %v376_v1, %v1968_v51  ;;  %v374_v41 = vadd.s32 %v1967_v50, %v1964_v49  ;;  %vm776_vm5 = vcmask 1040384  }
  0x3b   :  { %v458_v62 = vsel %vm456_vm12, %v446_v61, 2102212464  ;;  %v462_v6 = vsel %vm456_vm12, %v449_v2, 920167782  ;;  %v465_v7 = vsel %vm453_vm8, %v443_v53, %v446_v61  ;;  %v378_v8 = vadd.s32 %v377_v5, %v373_v60 }
  0x3c   :  { %v459_v9 = vsel %vm455_vm11, %v443_v53, %v458_v62  ;;  %v463_v10 = vsel %vm455_vm11, %v446_v61, %v462_v6  ;;  %v466_v11 = vsel %vm456_vm12, %v452_v3, 1326507024  ;;  %vm410_vm12 = vweird.f32 %v1860_v20 }
  0x3d   :  { %v460_v13 = vsel %vm454_vm9, %v457_v4, %v459_v9  ;;  %v464_v14 = vsel %vm454_vm9, %v461_v63, %v463_v10  ;;  %v467_v15 = vsel %vm455_vm11, %v449_v2, %v466_v11  ;;  %v379_v16 = vadd.s32 536870912, %v378_v8 }
  0x3e   :  { %v468_v18 = vsel %vm454_vm9, %v465_v7, %v467_v15  ;;  %v1988_v19 = vmul.u32.u64.low %v1943_v0, %v464_v14  ;;  %v1989_v22 = vmul.u32.u64.high %v1943_v0, %v464_v14, %v1988_v19  ;;  %v476_v27 = vmul.u32 %v1943_v0, %v460_v13 }
  0x3f   :  { %v1992_v23 = vmul.u32.u64.low %v1943_v0, %v468_v18  ;;  %v1993_v24 = vmul.u32.u64.high %v1943_v0, %v468_v18, %v1992_v23  ;;  %v380_v25 = vshrl.u32 %v379_v16, 30  ;;  %v129_v14 = vlaneseq }
  0x40   :  { %v479_v29 = vadd.s32 1, %v1989_v22 }
  0x41   :  { %v381_v28 = vshll.u32 %v380_v25, 30  ;;  %vm478_vm13 = vc.u32 %v1993_v24, %v1988_v19  ;;  %v477_v57 = vadd.s32 %v1988_v19, %v1993_v24  ;;  %v404_v1 = vsub.s32 4, %v380_v25 }
  0x42   :  { %v480_v12 = vsel %vm478_vm13, %v479_v29, %v1989_v22  ;;  %v130_v19 = vshrl.u32 %v129_v14, 7  ;;  %vm873_vm13 = vcmask 1041408  }
  0x43   :  { %v382_v31 = vsub.s32 %v378_v8, %v381_v28  ;;  %v481_v32 = vadd.s32 %v480_v12, %v476_v27  ;;  %v405_v6 = vsel %vm320_vm1, %v404_v1, %v380_v25 }
  0x44   :  { %v407_v13 = vsel %vm319_vm2, 0, %v405_v6  ;;  %v2009_v29 = vsub.s32 0, %v130_v19  ;;  %v2013_v12 = vsub.s32 3, %v130_v19  ;;  %v2017_v30 = vsub.s32 4, %v130_v19 }
  0x45   :  { %v384_v33 = vsub.s32 0, %v382_v31  ;;  %v482_v34 = vadd.s32 536870912, %v481_v32  ;;  %v617_v26 = vadd.s32 3, %v407_v13  ;;  %v411_v25 = vand.u32 3, %v407_v13 }
  0x47   :  { %v1515_v35 = vmin.u32 %v384_v33, %v382_v31  ;;  %v483_v36 = vshrl.u32 %v482_v34, 30  ;;  %v618_v27 = vand.u32 3, %v617_v26  ;;  %vm416_vm6 = vcmp.eq.s32.totalorder %v411_v25, 2 }
  0x48   :  { %v2019_v34 = vsub.s32 7, %v130_v19  ;;  %vm413_vm8 = vcmp.eq.s32.totalorder %v411_v25, 0  ;;  %vm412_vm10 = vcmp.lt.s32.totalorder %v411_v25, 2 }
  0x49   :  { %v386_v37 = vclz %v1515_v35  ;;  %v484_v38 = vshll.u32 %v483_v36, 30  ;;  %v507_v10 = vsub.s32 4, %v483_v36  ;;  %vm623_vm7 = vcmp.eq.s32.totalorder %v618_v27, 2 }
  0x4a   :  { %vm620_vm9 = vcmp.eq.s32.totalorder %v618_v27, 0  ;;  %vm619_vm11 = vcmp.lt.s32.totalorder %v618_v27, 2 }
  0x4b   :  { %v1516_v39 = vadd.s32 4294967294, %v386_v37  ;;  %v485_v40 = vsub.s32 %v481_v32, %v484_v38  ;;  %v508_v16 = vsel %vm423_vm3, %v507_v10, %v483_v36  ;;  %v2015_v32 = vsub.s32 5, %v130_v19 }
  0x4c   :  { %v510_v23 = vsel %vm422_vm4, 0, %v508_v16 }
  0x4d   :  { %vm1517_vm14 = vcmp.lt.s32.totalorder %v1516_v39, 0  ;;  %v487_v42 = vsub.s32 0, %v485_v40  ;;  %v721_v28 = vadd.s32 3, %v510_v23  ;;  %v514_v35 = vand.u32 3, %v510_v23 }
  0x4e   :  { %v389_v0 = vsel %vm1517_vm14, 0, %v1516_v39  ;;  %vm513_vm14 = vweird.f32 %v1862_v21 }
  0x4f   :  { %v390_v43 = vsub.s32 32, %v389_v0  ;;  %v391_v44 = vshll.u32 %v382_v31, %v389_v0  ;;  %v394_v45 = vsub.s32 4294967266, %v389_v0  ;;  %v1519_v46 = vmin.u32 %v487_v42, %v485_v40 }
  0x50   :  { %v2011_v31 = vsub.s32 2, %v130_v19  ;;  %v722_v38 = vand.u32 3, %v721_v28  ;;  %v2024_v42 = vsub.s32 1, %v130_v19 }
  0x51   :  { %v392_v47 = vshrl.u32 %v374_v41, %v390_v43  ;;  %v395_v48 = vadd.s32 127, %v394_v45  ;;  %v489_v51 = vclz %v1519_v46 }
  0x53   :  { %v393_v52 = vor.u32 %v392_v47, %v391_v44  ;;  %v396_v53 = vshll.u32 %v395_v48, 23  ;;  %v1520_v54 = vadd.s32 4294967294, %v489_v51 }
  0x55   :  { %v397_v55 = vor.u32 4788187, %v396_v53  ;;  %v400_v56 = vcvt.s32.f32 %v393_v52  ;;  %vm1521_vm15 = vcmp.lt.s32.totalorder %v1520_v54, 0 }
  0x56   :  { %v492_v49 = vsel %vm1521_vm15, 0, %v1520_v54  ;;  %vm515_vm15 = vcmp.lt.s32.totalorder %v514_v35, 2 }
  0x57   :  { %v398_v58 = vand.u32 2147483647, %v397_v55  ;;  %v493_v50 = vsub.s32 32, %v492_v49  ;;  %v494_v59 = vshll.u32 %v485_v40, %v492_v49  ;;  %v497_v60 = vsub.s32 4294967266, %v492_v49 }
  0x58   :  { %v2021_v40 = vsub.s32 6, %v130_v19 }
  0x59   :  { %v401_v61 = vmul.f32 %v400_v56, %v398_v58  ;;  %v495_v2 = vshrl.u32 %v477_v57, %v493_v50  ;;  %v498_v3 = vadd.s32 127, %v497_v60 }
  0x5b   :  { %v402_v4 = vxor.u32 2147483648, %v401_v61  ;;  %v496_v63 = vor.u32 %v495_v2, %v494_v59  ;;  %v499_v5 = vshll.u32 %v498_v3, 23 }
  0x5d   :  { %v403_v62 = vsel %vm320_vm1, %v402_v4, %v401_v61  ;;  %v500_v8 = vor.u32 4788187, %v499_v5  ;;  %v503_v9 = vcvt.s32.f32 %v496_v63  ;;  %vm516_vm1 = vcmp.eq.s32.totalorder %v514_v35, 0 }
  0x5e   :  { %v406_v7 = vsel %vm319_vm2, %v1860_v20, %v403_v62  ;;  %vm519_vm2 = vcmp.eq.s32.totalorder %v514_v35, 2 }
  0x5f   :  { %1555 = vcosq.f32 %v406_v7  ;;  %v501_v11 = vand.u32 2147483647, %v500_v8 }
  0x60   :  { %1557 = vsinq.f32 %v406_v7 }
  0x61   :  { %v504_v15 = vmul.f32 %v503_v9, %v501_v11 }
  0x63   :  { %v505_v18 = vxor.u32 2147483648, %v504_v15 }
  0x65   :  { %v506_v22 = vsel %vm423_vm3, %v505_v18, %v504_v15  ;;  %vm723_vm3 = vcmp.lt.s32.totalorder %v722_v38, 2 }
  0x66   :  { %v509_v24 = vsel %vm422_vm4, %v1862_v21, %v506_v22  ;;  %vm724_vm4 = vcmp.eq.s32.totalorder %v722_v38, 0 }
  0x67   :  { %1559 = vcosq.f32 %v509_v24 }
  0x68   :  { %1561 = vsinq.f32 %v509_v24 }
  0x6c   :  { %v1556_v33 = vpop.eup %1555 }
  0x6d   :  { %v1558_v36 = vpop.eup %1557  ;;  %v417_v37 = vxor.u32 2147483648, %v1556_v33 }
  0x6e   :  { %v414_v39 = vxor.u32 2147483648, %v1558_v36 }
  0x6f   :  { %v418_v41 = vsel %vm416_vm6, %v417_v37, %v1558_v36  ;;  %v625_v0 = vsel %vm623_vm7, %v417_v37, %v1558_v36  ;;  %vm727_vm6 = vcmp.eq.s32.totalorder %v722_v38, 2  ;;  %vm1342_vm7 = vcmask 261120  }
  0x70   :  { %v415_v43 = vsel %vm413_vm8, %v1556_v33, %v414_v39  ;;  %v622_v44 = vsel %vm620_vm9, %v1556_v33, %v414_v39  ;;  %vm1497_vm8 = vcmask 64516  }
  0x71   :  { %v419_v45 = vsel %vm412_vm10, %v415_v43, %v418_v41  ;;  %v626_v46 = vsel %vm619_vm11, %v622_v44, %v625_v0  ;;  %vm1498_vm9 = vmor %vm1497_vm8, %vm153_vm0 }
  0x72   :  { %v2027_v47 = vsel %vm410_vm12, nan, %v419_v45  ;;  %v2029_v48 = vsel %vm410_vm12, nan, %v626_v46 }
  0x73   :  { %v741_v20 = vrot.slane %v2027_v47, %v2015_v32  ;;  %v763_v51 = vrot.slane %v2029_v48, %v2015_v32  ;;  %v788_v52 = vrot.slane %v2027_v47, %v2017_v30  ;;  %v828_v53 = vrot.slane %v2029_v48, %v2017_v30 }
  0x74   :  { %v885_v54 = vrot.slane %v2027_v47, %v2019_v34  ;;  %v905_v55 = vrot.slane %v2029_v48, %v2019_v34  ;;  %v929_v56 = vrot.slane %v2027_v47, %v2021_v40  ;;  %v969_v57 = vrot.slane %v2029_v48, %v2021_v40  ;;  %v1560_v58 = vpop.eup %1559 }
  0x75   :  { %v778_v49 = vsel %vm776_vm5, %v741_v20, %v763_v51  ;;  %v808_v50 = vrot.slane %v788_v52, %v2009_v29  ;;  %v848_v59 = vrot.slane %v828_v53, %v2009_v29  ;;  %v737_v60 = vrot.slane %v2027_v47, %v2024_v42  ;;  %v1562_v61 = vpop.eup %1561 }
  0x76   :  { %v919_v1 = vsel %vm776_vm5, %v885_v54, %v905_v55  ;;  %v949_v2 = vrot.slane %v929_v56, %v2011_v31  ;;  %v989_v3 = vrot.slane %v969_v57, %v2011_v31  ;;  %v520_v4 = vxor.u32 2147483648, %v1560_v58 }
  0x77   :  { %v818_v63 = vmul.f32 %v808_v50, %v778_v49  ;;  %v858_v5 = vmul.f32 %v848_v59, %v778_v49  ;;  %v517_v62 = vxor.u32 2147483648, %v1562_v61  ;;  %v759_v6 = vrot.slane %v2029_v48, %v2024_v42 }
  0x78   :  { %v959_v7 = vmul.f32 %v949_v2, %v919_v1  ;;  %v999_v8 = vmul.f32 %v989_v3, %v919_v1  ;;  %v521_v9 = vsel %vm519_vm2, %v520_v4, %v1562_v61  ;;  %v729_v10 = vsel %vm727_vm6, %v520_v4, %v1562_v61 }
  0x79   :  { %v866_v11 = vrot.slane %v858_v5, 6  ;;  %v518_v13 = vsel %vm516_vm1, %v1560_v58, %v517_v62  ;;  %v726_v14 = vsel %vm724_vm4, %v1560_v58, %v517_v62  ;;  %v777_v15 = vsel %vm776_vm5, %v737_v60, %v759_v6 }
  0x7a   :  { %v1007_v16 = vrot.slane %v999_v8, 6  ;;  %v522_v26 = vsel %vm515_vm15, %v518_v13, %v521_v9  ;;  %v730_v18 = vsel %vm723_vm3, %v726_v14, %v729_v10  ;;  %v784_v19 = vrot.slane %v2027_v47, %v2009_v29 }
  0x7b   :  { %v2067_v22 = vsel %vm873_vm13, %v818_v63, %v866_v11  ;;  %v2071_v23 = vsel %vm513_vm14, nan, %v522_v26  ;;  %v2075_v24 = vsel %vm513_vm14, nan, %v730_v18  ;;  %v824_v25 = vrot.slane %v2029_v48, %v2009_v29 }
  0x7c   :  { %v2080_v27 = vsel %vm873_vm13, %v959_v7, %v1007_v16  ;;  %v1065_v28 = vrot.slane %v2067_v22, %v2011_v31  ;;  %v1085_v33 = vrot.slane %v2067_v22, %v2013_v12  ;;  %v749_v35 = vrot.slane %v2071_v23, %v2015_v32 }
  0x7d   :  { %v771_v21 = vrot.slane %v2075_v24, %v2015_v32  ;;  %v796_v36 = vrot.slane %v2071_v23, %v2017_v30  ;;  %v836_v37 = vrot.slane %v2075_v24, %v2017_v30  ;;  %v893_v38 = vrot.slane %v2071_v23, %v2019_v34 }
  0x7e   :  { %v1075_v39 = vmul.f32 %v1065_v28, %v2080_v27  ;;  %v1095_v41 = vmul.f32 %v1085_v33, %v2080_v27  ;;  %v913_v0 = vrot.slane %v2075_v24, %v2019_v34  ;;  %v937_v43 = vrot.slane %v2071_v23, %v2021_v40 }
  0x7f   :  { %v780_v32 = vsel %vm776_vm5, %v749_v35, %v771_v21  ;;  %v816_v44 = vrot.slane %v796_v36, %v2009_v29  ;;  %v856_v45 = vrot.slane %v836_v37, %v2009_v29  ;;  %v977_v30 = vrot.slane %v2075_v24, %v2021_v40 }
  0x80   :  { %v1115_v46 = vrot.slane %v1095_v41, 4  ;;  %v921_v20 = vsel %vm776_vm5, %v893_v38, %v913_v0  ;;  %v957_v51 = vrot.slane %v937_v43, %v2011_v31  ;;  %v804_v52 = vrot.slane %v784_v19, %v2009_v29 }
  0x81   :  { %v820_v34 = vmul.f32 %v816_v44, %v780_v32  ;;  %v860_v53 = vmul.f32 %v856_v45, %v780_v32  ;;  %v997_v54 = vrot.slane %v977_v30, %v2011_v31  ;;  %v844_v55 = vrot.slane %v824_v25, %v2009_v29 }
  0x82   :  { %v1127_v56 = vsel %vm153_vm0, %v1075_v39, %v1115_v46  ;;  %v961_v57 = vmul.f32 %v957_v51, %v921_v20  ;;  %v817_v58 = vmul.f32 %v804_v52, %v777_v15  ;;  %v881_v40 = vrot.slane %v2027_v47, %v2013_v12 }
  0x83   :  { %1175 = vmatprep.subr.mxu0 %v1127_v56  ;;  %v868_v49 = vrot.slane %v860_v53, 6  ;;  %v1001_v50 = vmul.f32 %v997_v54, %v921_v20  ;;  %v857_v59 = vmul.f32 %v844_v55, %v777_v15  ;;  %v901_v60 = vrot.slane %v2029_v48, %v2013_v12 }
  0x84   :  { %v925_v61 = vrot.slane %v2027_v47, %v2011_v31  ;;  %v965_v1 = vrot.slane %v2029_v48, %v2011_v31  ;;  %v745_v2 = vrot.slane %v2071_v23, %v2024_v42  ;;  %v767_v3 = vrot.slane %v2075_v24, %v2024_v42 }
  0x85   :  { %v877_v4 = vsel %vm873_vm13, %v820_v34, %v868_v49  ;;  %v1009_v63 = vrot.slane %v1001_v50, 6  ;;  %v865_v5 = vrot.slane %v857_v59, 6  ;;  %v918_v62 = vsel %vm776_vm5, %v881_v40, %v901_v60 }
  0x86   :  { %v1073_v6 = vrot.slane %v877_v4, %v2011_v31  ;;  %v1093_v7 = vrot.slane %v877_v4, %v2013_v12  ;;  %v945_v47 = vrot.slane %v925_v61, %v2011_v31  ;;  %v985_v48 = vrot.slane %v965_v1, %v2011_v31 }
  0x87   :  { %v1017_v8 = vsel %vm873_vm13, %v961_v57, %v1009_v63  ;;  %v874_v9 = vsel %vm873_vm13, %v817_v58, %v865_v5  ;;  %v779_v10 = vsel %vm776_vm5, %v745_v2, %v767_v3  ;;  %v792_v11 = vrot.slane %v2071_v23, %v2009_v29 }
  0x88   :  { %v1077_v13 = vmul.f32 %v1073_v6, %v1017_v8  ;;  %v1097_v14 = vmul.f32 %v1093_v7, %v1017_v8  ;;  %v958_v15 = vmul.f32 %v945_v47, %v918_v62  ;;  %v998_v16 = vmul.f32 %v985_v48, %v918_v62 }
  0x89   :  { %v1061_v26 = vrot.slane %v874_v9, %v2011_v31  ;;  %v1081_v18 = vrot.slane %v874_v9, %v2013_v12  ;;  %v812_v19 = vrot.slane %v792_v11, %v2009_v29  ;;  %v832_v25 = vrot.slane %v2075_v24, %v2009_v29 }
  0x8a   :  { %v1117_v28 = vrot.slane %v1097_v14, 4  ;;  %v1006_v33 = vrot.slane %v998_v16, 6  ;;  %v889_v35 = vrot.slane %v2071_v23, %v2013_v12  ;;  %v909_v21 = vrot.slane %v2075_v24, %v2013_v12 }
  0x8b   :  { %v819_v36 = vmul.f32 %v812_v19, %v779_v10  ;;  %v852_v37 = vrot.slane %v832_v25, %v2009_v29  ;;  %v933_v38 = vrot.slane %v2071_v23, %v2011_v31  ;;  %v973_v39 = vrot.slane %v2075_v24, %v2011_v31  ;;  %v1133_v19 = vld [vmem:[%s2237_s4 + $0x18] sm:$0xff]  ;;  %v127_v25 = vld [vmem:[%s2238_s3] sm:$0xf] }
  0x8c   :  { %v1129_v41 = vsel %vm153_vm0, %v1077_v13, %v1117_v28  ;;  %v1014_v0 = vsel %vm873_vm13, %v958_v15, %v1006_v33  ;;  %v920_v43 = vsel %vm776_vm5, %v889_v35, %v909_v21  ;;  %v1025_v32 = vrot.slane %v2067_v22, %v2009_v29 }
  0x8d   :  { %1264 = vmatprep.subr.mxu1 %v1129_v41  ;;  %v1074_v44 = vmul.f32 %v1061_v26, %v1014_v0  ;;  %v1094_v45 = vmul.f32 %v1081_v18, %v1014_v0  ;;  %v859_v30 = vmul.f32 %v852_v37, %v779_v10  ;;  %v953_v46 = vrot.slane %v933_v38, %v2011_v31  ;;  %v1131_v26 = vld [vmem:[%s2237_s4 + $0x8] sm:$0xff]  ;;  %v1132_v18 = vld [vmem:[%s2237_s4 + $0x10] sm:$0xff] }
  0x8e   :  { %v993_v23 = vrot.slane %v973_v39, %v2011_v31  ;;  %v1035_v20 = vmul.f32 %v1025_v32, %v2080_v27  ;;  %v1045_v24 = vrot.slane %v2067_v22, %v2024_v42  ;;  %v1033_v34 = vrot.slane %v877_v4, %v2009_v29 }
  0x8f   :  { %v1114_v51 = vrot.slane %v1094_v45, 4  ;;  %v867_v52 = vrot.slane %v859_v30, 6  ;;  %v1053_v53 = vrot.slane %v877_v4, %v2024_v42  ;;  %v960_v54 = vmul.f32 %v953_v46, %v920_v43 }
  0x90   :  { %v1000_v55 = vmul.f32 %v993_v23, %v920_v43  ;;  %v1055_v56 = vmul.f32 %v1045_v24, %v2080_v27  ;;  %v1021_v57 = vrot.slane %v874_v9, %v2009_v29  ;;  %v1041_v50 = vrot.slane %v874_v9, %v2024_v42 }
  0x91   :  { %v1126_v58 = vsel %vm153_vm0, %v1074_v44, %v1114_v51  ;;  %v876_v40 = vsel %vm873_vm13, %v819_v36, %v867_v52  ;;  %v1057_v49 = vmul.f32 %v1053_v53, %v1017_v8  ;;  %v1037_v1 = vmul.f32 %v1033_v34, %v1017_v8  ;;  %v1130_v8 = vld [vmem:[%s2237_s4] sm:$0xff] }
  0x92   :  { %1176 = vmatpush1.msra.mxu0 %v1126_v58  ;;  %v1008_v22 = vrot.slane %v1000_v55, 6  ;;  %v1069_v59 = vrot.slane %v876_v40, %v2011_v31  ;;  %v1089_v60 = vrot.slane %v876_v40, %v2013_v12  ;;  %v1103_v61 = vrot.slane %v1055_v56, 4 }
  0x93   :  { %v1034_v2 = vmul.f32 %v1021_v57, %v1014_v0  ;;  %v1054_v3 = vmul.f32 %v1041_v50, %v1014_v0  ;;  %v1029_v27 = vrot.slane %v876_v40, %v2009_v29  ;;  %v1105_v5 = vrot.slane %v1057_v49, 4 }
  0x94   :  { %v1016_v4 = vsel %vm873_vm13, %v960_v54, %v1008_v22  ;;  %v1123_v63 = vsel %vm153_vm0, %v1035_v20, %v1103_v61  ;;  %v1049_v62 = vrot.slane %v876_v40, %v2024_v42  ;;  %vm1134_vm5 = vcmask 130048  }
  0x95   :  { %v1076_v6 = vmul.f32 %v1069_v59, %v1016_v4  ;;  %v1096_v7 = vmul.f32 %v1089_v60, %v1016_v4  ;;  %1177 = vmatprep.subr.mxu0 %v1123_v63  ;;  %v1102_v47 = vrot.slane %v1054_v3, 4  ;;  %v1036_v48 = vmul.f32 %v1029_v27, %v1016_v4 }
  0x96   :  { %v1056_v9 = vmul.f32 %v1049_v62, %v1016_v4  ;;  %v1125_v13 = vsel %vm153_vm0, %v1037_v1, %v1105_v5  ;;  %v132_v28 = vrot.slane %v127_v25, %v2009_v29  ;;  %v140_v33 = vrot.slane %v127_v25, %v2011_v31  ;;  %v1341_v1 = vld [vmem:[%s2240_s5] sm:$0xf] }
  0x97   :  { %v1116_v10 = vrot.slane %v1096_v7, 4  ;;  %v1122_v11 = vsel %vm153_vm0, %v1034_v2, %v1102_v47  ;;  %v136_v35 = vrot.slane %v127_v25, %v2024_v42  ;;  %v144_v21 = vrot.slane %v127_v25, %v2013_v12 }
  0x98   :  { %1178 = vmatpush1.msra.mxu0 %v1122_v11  ;;  %v1104_v14 = vrot.slane %v1056_v9, 4 }
  0x99   :  { %v1128_v15 = vsel %vm153_vm0, %v1076_v6, %v1116_v10  ;;  %1530 = vmatmul.mubr.msk.f32.vlgmr.msra.gmra.mxu0 %vm1134_vm5, %v1130_v8 }
  0x9a   :  { %1265 = vmatpush1.msra.mxu1 %v1128_v15  ;;  %v1124_v16 = vsel %vm153_vm0, %v1036_v48, %v1104_v14  ;;  %1217 = vmatprep.mubr.f32.mxu0 %v1568_v17 }
  0x9b   :  { %1266 = vmatprep.subr.mxu1 %v1125_v13 }
  0x9c   :  { %1267 = vmatpush1.msra.mxu1 %v1124_v16 }
  0x9d   :  { %1534 = vmatmul.mubr.msk.f32.vlgmr.msra.gmra.mxu1 %vm1134_vm5, %v1130_v8  ;;  %1531 = vmatmul.mubr.msk.f32.gmra.mxu0 %vm1134_vm5, %v1131_v26 }
  0x9e   :  { %1306 = vmatprep.mubr.f32.mxu1 %v1568_v17  ;;  %1223 = vmatprep.mubr.f32.mxu0 %v1568_v17 }
  0xa1   :  { %1535 = vmatmul.mubr.msk.f32.gmra.mxu1 %vm1134_vm5, %v1131_v26  ;;  %1532 = vmatmul.mubr.msk.f32.gmra.mxu0 %vm1134_vm5, %v1132_v18 }
  0xa2   :  { %1312 = vmatprep.mubr.f32.mxu1 %v1568_v17  ;;  %1229 = vmatprep.mubr.f32.mxu0 %v1568_v17 }
  0xa5   :  { %1536 = vmatmul.mubr.msk.f32.gmra.mxu1 %vm1134_vm5, %v1132_v18  ;;  %1533 = vmatmul.mubr.msk.f32.gmra.mxu0 %vm1134_vm5, %v1133_v19 }
  0xa6   :  { %1318 = vmatprep.mubr.f32.mxu1 %v1568_v17  ;;  %1410 = vmatprep.mubr.f32.mxu0 %v1568_v17 }
  0xa9   :  { %1537 = vmatmul.mubr.msk.f32.gmra.mxu1 %vm1134_vm5, %v1133_v19 }
  0xaa   :  { %1481 = vmatprep.mubr.f32.mxu1 %v1568_v17 }
  0xf5   :  { %v232_v36 = vpop.f32.mrf.mxu0  ;;  %v303_v37 = vpop.f32.mrf.mxu1 }
  0xf6   :  { %v233_v38 = vadd.f32 %v232_v36, %v132_v28  ;;  %v304_v39 = vadd.f32 %v303_v37, %v140_v33 }
  0xf7   :  { %v234_v41 = vpop.f32.mrf.mxu0  ;;  %v305_v0 = vpop.f32.mrf.mxu1 }
  0xf8   :  { %308 = vst [vmem:[%s2239_s6] sm:$0xff] %v233_v38  ;;  %310 = vst [vmem:[%s2239_s6 + $0x10] sm:$0xff] %v304_v39  ;;  %v235_v17 = vadd.f32 %v234_v41, %v136_v35  ;;  %v306_v29 = vadd.f32 %v305_v0, %v144_v21 }
  0xfa   :  { %309 = vst [vmem:[%s2239_s6 + $0x8] sm:$0xff] %v235_v17  ;;  %311 = vst [vmem:[%s2239_s6 + $0x18] sm:$0xff] %v306_v29 }
 0x159   :  { %v1213_v31 = vpop.f32.mrf.mxu0 }
 0x15a   :  { %v1325_v60 = vmul.f32 %v1213_v31, %v1213_v31 }
 0x15b   :  { %v1215_v12 = vpop.f32.mrf.mxu0 }
 0x15c   :  { %v1326_v22 = vmul.f32 %v1215_v12, %v1215_v12 }
 0x15d   :  { %v1302_v42 = vpop.f32.mrf.mxu1  ;;  %v1219_v43 = vpop.f32.mrf.mxu0 }
 0x15e   :  { %v1329_v49 = vmul.f32 %v1219_v43, %v1219_v43  ;;  %v1327_v4 = vmul.f32 %v1302_v42, %v1302_v42 }
 0x15f   :  { %v1304_v32 = vpop.f32.mrf.mxu1  ;;  %v1221_v44 = vpop.f32.mrf.mxu0 }
 0x160   :  { %v1330_v58 = vmul.f32 %v1221_v44, %v1221_v44  ;;  %v1328_v27 = vmul.f32 %v1304_v32, %v1304_v32 }
 0x161   :  { %v1308_v45 = vpop.f32.mrf.mxu1  ;;  %v1225_v30 = vpop.f32.mrf.mxu0 }
 0x162   :  { %v1333_v56 = vmul.f32 %v1225_v30, %v1225_v30  ;;  %v1331_v3 = vmul.f32 %v1308_v45, %v1308_v45 }
 0x163   :  { %v1310_v46 = vpop.f32.mrf.mxu1  ;;  %v1227_v23 = vpop.f32.mrf.mxu0 }
 0x164   :  { %v1334_v55 = vmul.f32 %v1227_v23, %v1227_v23  ;;  %v1332_v2 = vmul.f32 %v1310_v46, %v1310_v46 }
 0x165   :  { %v1314_v20 = vpop.f32.mrf.mxu1  ;;  %v1231_v24 = vpop.f32.mrf.mxu0 }
 0x166   :  { %v1337_v53 = vmul.f32 %v1231_v24, %v1231_v24  ;;  %v1335_v61 = vmul.f32 %v1314_v20, %v1314_v20 }
 0x167   :  { %v1316_v51 = vpop.f32.mrf.mxu1  ;;  %v1233_v52 = vpop.f32.mrf.mxu0 }
 0x168   :  { %v1338_v34 = vmul.f32 %v1233_v52, %v1233_v52  ;;  %v1336_v59 = vmul.f32 %v1316_v51, %v1316_v51 }
 0x169   :  { %v1320_v54 = vpop.f32.mrf.mxu1 }
 0x16a   :  { %1370 = vmatprep.subr.mxu0 %v1338_v34  ;;  %v1339_v50 = vmul.f32 %v1320_v54, %v1320_v54 }
 0x16b   :  { %v1322_v57 = vpop.f32.mrf.mxu1  ;;  %1371 = vmatpush1.msra.mxu0 %v1337_v53 }
 0x16c   :  { %v1340_v40 = vmul.f32 %v1322_v57, %v1322_v57  ;;  %1372 = vmatprep.subr.mxu0 %v1334_v55 }
 0x16d   :  { %1373 = vmatpush1.msra.mxu0 %v1333_v56 }
 0x16e   :  { %1441 = vmatprep.subr.mxu1 %v1340_v40  ;;  %1374 = vmatprep.subr.mxu0 %v1330_v58 }
 0x16f   :  { %1442 = vmatpush1.msra.mxu1 %v1339_v50  ;;  %1375 = vmatpush1.msra.mxu0 %v1329_v49 }
 0x170   :  { %1443 = vmatprep.subr.mxu1 %v1336_v59  ;;  %1376 = vmatprep.subr.mxu0 %v1326_v22 }
 0x171   :  { %1444 = vmatpush1.msra.mxu1 %v1335_v61  ;;  %1377 = vmatpush1.msra.mxu0 %v1325_v60 }
 0x172   :  { %1445 = vmatprep.subr.mxu1 %v1332_v2  ;;  %1538 = vmatmul.mubr.msk.f32.vlgmr.msra.gmra.mxu0 %vm1342_vm7, %v1341_v1 }
 0x173   :  { %1446 = vmatpush1.msra.mxu1 %v1331_v3 }
 0x174   :  { %1447 = vmatprep.subr.mxu1 %v1328_v27 }
 0x175   :  { %1448 = vmatpush1.msra.mxu1 %v1327_v4 }
 0x176   :  { %1539 = vmatmul.mubr.msk.f32.vlgmr.msra.gmra.mxu1 %vm1342_vm7, %v1341_v1 }
 0x232   :  { %v1412_v63 = vpop.f32.mrf.mxu0 }
 0x234   :  { %v1414_v5 = vpop.f32.mrf.mxu0 }
 0x235   :  { %v1492_v62 = vcombine.low %v1412_v63, %v1414_v5 }
 0x236   :  { %v1483_v6 = vpop.f32.mrf.mxu1 }
 0x237   :  { %1496 = vst [vmem:[%s2241_s7] sm:$0xff] %v1492_v62 }
 0x238   :  { %v1485_v7 = vpop.f32.mrf.mxu1 }
 0x239   :  { %v1493_v47 = vcombine.low %v1483_v6, %v1485_v7 }
 0x23b   :  { %1499 = vst.msk [vmem:[%s2241_s7 + $0x8] sm:$0xff] %vm1498_vm9, %v1493_v47 }

</bundles_post_ra>
